<compile_context>
chip_gen: v5e
topology: v5e:2x2
jax: 0.10.0
libtpu: 0.0.40
codegen_flags: <defaults>
</compile_context>

<pallas_src>
import jax
import jax.numpy as jnp
from jax.experimental import pallas as pl
from jax.experimental.pallas import tpu as pltpu

EPS = 1e-5
MOMENTUM = 0.1


# ------------------------------ Pallas kernel --------------------------------
def _scale_shift_kernel(x_ref, scale_ref, shift_ref, o_ref):
    # x_ref/o_ref: (tr, tc)   scale_ref/shift_ref: (tr, 1) f32 (lane-broadcast)
    x = x_ref[...].astype(jnp.float32)
    o_ref[...] = (x * scale_ref[...] + shift_ref[...]).astype(o_ref.dtype)


def _vmem_limit_bytes():
    """Explicit scoped-VMEM limit: capacity minus headroom, capped for v5e/v6e."""
    cap = 64 << 20  # v7x physical VMEM -- the smallest across generations
    try:
        info = pltpu.get_tpu_info()
        cap = int(getattr(info, "vmem_capacity_bytes", cap))
    except Exception:
        pass
    return int(min(max(cap - (16 << 20), 32 << 20), 100 << 20))


def _pick_tiles(rows, cols, itemsize, vmem_budget):
    """Pick (tr, tc) for a (rows, cols) elementwise stream.

    Accounts for 4 live stream buffers (double-buffered x and out) of (tr, tc)
    plus 4 lane-padded (tr, 128) f32 buffers for scale/shift.  Lane tile is a
    multiple of 128 (or the full extent when cols <= 128); row tile is a
    multiple of 8 (or the full extent).  Never returns a tile bigger than the
    budget allows, and never requires a "full plane" fallback.
    """
    tr0 = rows if rows < 8 else 8
    if cols <= 128:
        tc = cols
    else:
        max_tc = vmem_budget // (4 * itemsize * tr0)
        tc = max(128, (min(max_tc, cols) // 128) * 128)

    per_row_bytes = 4 * tc * itemsize + 4 * 128 * 4  # x/out tiles + padded scale/shift
    max_tr = max(vmem_budget // per_row_bytes, 1)
    if max_tr >= rows or rows < 8:
        tr = rows
    else:
        tr = max(8, (min(max_tr, rows) // 8) * 8)

    # Guarantee >= 2 grid steps so v7x's second TensorCore gets work; the extra
    # ~0.35 us step is negligible and v5e/v6e (1 TC) are unaffected.
    n_steps = (-(-rows // tr)) * (-(-cols // tc))
    if n_steps < 2:
        if rows >= 16:
            tr = max(8, ((rows // 2 + 7) // 8) * 8)
        elif cols >= 256:
            tc = max(128, ((cols // 2 + 127) // 128) * 128)
    return tr, tc


def _apply_scale_shift(feat_bchw, scale_c, shift_c):
    """Fused per-channel `x * scale + shift` over an NCHW tensor (one pallas_call)."""
    B, C, H, W = feat_bchw.shape
    rows, cols = B * C, H * W
    x = feat_bchw.reshape(rows, cols)
    itemsize = jnp.dtype(feat_bchw.dtype).itemsize

    vmem_limit = _vmem_limit_bytes()
    tr, tc = _pick_tiles(rows, cols, itemsize, vmem_limit - (4 << 20))
    n_r = pl.cdiv(rows, tr)
    n_c = pl.cdiv(cols, tc)

    # Per-(batch, channel)-row scale/shift; row r = b * C + c  ->  channel r % C.
    scale_rc = jnp.tile(scale_c.astype(jnp.float32), B).reshape(rows, 1)
    shift_rc = jnp.tile(shift_c.astype(jnp.float32), B).reshape(rows, 1)

    cost = pl.CostEstimate(
        flops=2 * rows * cols,
        transcendentals=0,
        bytes_accessed=itemsize * 2 * rows * cols + 4 * 2 * rows,
    )

    out = pl.pallas_call(
        _scale_shift_kernel,
        out_shape=jax.ShapeDtypeStruct((rows, cols), feat_bchw.dtype),
        grid=(n_r, n_c),
        in_specs=[
            pl.BlockSpec((tr, tc), lambda r, c: (r, c)),
            pl.BlockSpec((tr, 1), lambda r, c: (r, 0)),
            pl.BlockSpec((tr, 1), lambda r, c: (r, 0)),
        ],
        out_specs=pl.BlockSpec((tr, tc), lambda r, c: (r, c)),
        compiler_params=pltpu.CompilerParams(
            dimension_semantics=("parallel", "parallel"),
            vmem_limit_bytes=vmem_limit,
        ),
        cost_estimate=cost,
    )(x, scale_rc, shift_rc)
    return out.reshape(B, C, H, W)


# ------------------------- training-mode statistics ---------------------------
def _lower_median(x, axis=0):
    # torch.median(): lower median for even-length inputs.
    xs = jnp.sort(x, axis=axis)
    n = x.shape[axis]
    return jnp.take(xs, (n - 1) // 2, axis=axis)


def _masked_quantile(vals, mask, q):
    # vals: (N, C); mask: (N,) bool (same pixels valid for every channel).
    # Matches torch.quantile(..., interpolation='linear') over the valid subset.
    big = jnp.finfo(vals.dtype).max
    v = jnp.where(mask[:, None], vals, big)
    vs = jnp.sort(v, axis=0)
    n = jnp.maximum(jnp.sum(mask.astype(jnp.float32)), 1.0)
    pos = q * (n - 1.0)
    lo = jnp.clip(jnp.floor(pos).astype(jnp.int32), 0, vals.shape[0] - 1)
    hi = jnp.clip(jnp.ceil(pos).astype(jnp.int32), 0, vals.shape[0] - 1)
    frac = pos - jnp.floor(pos)
    v_lo = jnp.take(vs, lo, axis=0)
    v_hi = jnp.take(vs, hi, axis=0)
    return v_lo * (1.0 - frac) + v_hi * frac


def _masked_var(vals, mask, correction):
    m = mask[:, None].astype(vals.dtype)
    n = jnp.maximum(jnp.sum(mask.astype(vals.dtype)), 1.0)
    mean = jnp.sum(vals * m, axis=0) / n
    sq = jnp.sum(((vals - mean) ** 2) * m, axis=0)
    return sq / jnp.maximum(n - correction, 1.0)


def _train_stats(feat, masks):
    """median over ALL pixels, (q90 - q10) and unbiased var over mask-valid pixels."""
    B, C, H, W = feat.shape
    Bm, _, Hm, Wm = masks.shape
    kh, kw = Hm // H, Wm // W
    assert Hm == kh * H and Wm == kw * W
    assert kh % 2 == 0 and kw % 2 == 0, "only even pooling kernels supported"

    feat_nc = jnp.transpose(feat, (0, 2, 3, 1)).reshape(-1, C)          # (B*H*W, C)
    mean = _lower_median(feat_nc)                                        # median over all pixels

    # max_pool2d(masks, kernel=(kh,kw)) with stride == kernel  -> reshape/max trick
    m = masks.astype(jnp.float32).reshape(B, 1, H, kh, W, kw).max(axis=(3, 5)) > 0
    mask_flat = m.reshape(-1)                                            # (B*H*W,)
    # Guard: if the pooled mask is empty, fall back to all-valid so the masked
    # stats stay finite (the PyTorch module would NaN here).
    any_valid = jnp.any(mask_flat)
    mask_flat = jnp.logical_or(mask_flat, jnp.logical_not(any_valid))

    unbiased_var = _masked_var(feat_nc, mask_flat, correction=1.0)
    q_hi = _masked_quantile(feat_nc, mask_flat, 0.9)
    q_lo = _masked_quantile(feat_nc, mask_flat, 0.1)
    biased_var = q_hi - q_lo                                             # IQR-style "variance"
    return mean, biased_var, unbiased_var


# --------------------------------- forward ------------------------------------
def sparse_batchnorm2d_forward(params, state, feat, masks, *, training=False,
                               eps=EPS, momentum=MOMENTUM):
    """Functional SparseBatchNorm2d (affine=True, USE_MEAN=True, USE_BIAS=True,
    track_running_stats=True).  Returns (out, new_state)."""
    if training:
        mean, biased_var, unbiased_var = _train_stats(feat, masks)
        new_state = dict(
            running_mean=(1.0 - momentum) * state['running_mean'] + momentum * mean,
            running_var=(1.0 - momentum) * state['running_var'] + momentum * unbiased_var,
            num_batches_tracked=state['num_batches_tracked'] + 1,
        )
        inv = 1.0 / jnp.sqrt(biased_var + eps)
        scale = params['weight'] * inv
        shift = params['bias'] - mean * scale
    else:
        inv = 1.0 / jnp.sqrt(state['running_var'] + eps)
        scale = params['weight'] * inv
        shift = params['bias'] - state['running_mean'] * scale
        new_state = state
    return _apply_scale_shift(feat, scale, shift), new_state


# ---------------------------- pure-JAX reference ------------------------------
def ref_forward(params, state, feat, masks, *, training=False,
                eps=EPS, momentum=MOMENTUM):
    w = params['weight'][None, :, None, None]
    b = params['bias'][None, :, None, None]
    if training:
        mean, biased_var, _ = _train_stats(feat, masks)
        norm = (feat - mean[None, :, None, None]) / jnp.sqrt(
            biased_var[None, :, None, None] + eps)
    else:
        norm = (feat - state['running_mean'][None, :, None, None]) / jnp.sqrt(
            state['running_var'][None, :, None, None] + eps)
    return norm * w + b


# ------------------------------------ main -------------------------------------
if __name__ == "__main__":
    key = jax.random.PRNGKey(0)
    kf, km, kw_, kb, krm, krv = jax.random.split(key, 6)

    B, C, H, W = 2, 32, 16, 16
    feat = 2.0 * jax.random.normal(kf, (B, C, H, W), jnp.float32) + 0.5
    # masks come in at 2x the feature resolution (even pooling kernel required)
    masks = jax.random.uniform(km, (B, 1, 2 * H, 2 * W)) > 0.4

    params = dict(
        weight=jax.random.uniform(kw_, (C,), jnp.float32, 0.5, 1.5),
        bias=0.1 * jax.random.normal(kb, (C,), jnp.float32),
    )
    state = dict(
        running_mean=0.1 * jax.random.normal(krm, (C,), jnp.float32),
        running_var=jax.random.uniform(krv, (C,), jnp.float32, 0.5, 1.5),
        num_batches_tracked=jnp.array(0, jnp.int32),
    )

    # eval-mode forward (running statistics)
    out_eval, _ = sparse_batchnorm2d_forward(params, state, feat, masks,
                                             training=False)
    out_eval = jax.block_until_ready(out_eval)
    ref_eval = jax.block_until_ready(
        ref_forward(params, state, feat, masks, training=False))
    assert out_eval.shape == (B, C, H, W), out_eval.shape
    assert jnp.allclose(out_eval, ref_eval, atol=1e-4, rtol=1e-4), \
        float(jnp.max(jnp.abs(out_eval - ref_eval)))

    # training-mode forward (masked robust statistics + running-stat update)
    out_tr, new_state = sparse_batchnorm2d_forward(params, state, feat, masks,
                                                   training=True)
    out_tr = jax.block_until_ready(out_tr)
    ref_tr = jax.block_until_ready(
        ref_forward(params, state, feat, masks, training=True))
    assert jnp.allclose(out_tr, ref_tr, atol=1e-3, rtol=1e-3), \
        float(jnp.max(jnp.abs(out_tr - ref_tr)))
    assert int(new_state['num_batches_tracked']) == 1

    print("KERNEL_OK")
</pallas_src>

<mosaic_0001>
module attributes {stable_mosaic.version = 11 : i64} {
  func.func @_scale_shift_kernel(%arg0: i32, %arg1: i32, %arg2: memref<32x256xf32, #tpu.memory_space<vmem>>, %arg3: memref<32x1xf32, #tpu.memory_space<vmem>>, %arg4: memref<32x1xf32, #tpu.memory_space<vmem>>, %arg5: memref<32x256xf32, #tpu.memory_space<vmem>>) attributes {dimension_semantics = [#tpu.dimension_semantics<parallel>, #tpu.dimension_semantics<parallel>], iteration_bounds = array<i64: 2, 1>, scalar_prefetch = 0 : i64, scratch_operands = 0 : i64, tpu.core_type = #tpu.core_type<tc>, window_params = [{transform_indices = @transform_0, window_bounds = array<i64: 32, 256>}, {transform_indices = @transform_1, window_bounds = array<i64: 32, 1>}, {transform_indices = @transform_2, window_bounds = array<i64: 32, 1>}, {transform_indices = @transform_3, window_bounds = array<i64: 32, 256>}]} {
    %c0 = arith.constant 0 : index
    %c0_0 = arith.constant 0 : index
    %0 = vector.load %arg2[%c0, %c0_0] : memref<32x256xf32, #tpu.memory_space<vmem>>, vector<32x256xf32>
    %c0_1 = arith.constant 0 : index
    %c0_2 = arith.constant 0 : index
    %1 = vector.load %arg3[%c0_1, %c0_2] : memref<32x1xf32, #tpu.memory_space<vmem>>, vector<32x1xf32>
    %2 = vector.broadcast %1 : vector<32x1xf32> to vector<32x256xf32>
    %3 = arith.mulf %0, %2 : vector<32x256xf32>
    %c0_3 = arith.constant 0 : index
    %c0_4 = arith.constant 0 : index
    %4 = vector.load %arg4[%c0_3, %c0_4] : memref<32x1xf32, #tpu.memory_space<vmem>>, vector<32x1xf32>
    %5 = vector.broadcast %4 : vector<32x1xf32> to vector<32x256xf32>
    %6 = arith.addf %3, %5 : vector<32x256xf32>
    %c0_5 = arith.constant 0 : index
    %c0_6 = arith.constant 0 : index
    %7 = vector.load %arg5[%c0_5, %c0_6] : memref<32x256xf32, #tpu.memory_space<vmem>>, vector<32x256xf32>
    tpu.vector_store %arg5[%c0_5, %c0_6], %6 {strides = array<i32>} : memref<32x256xf32, #tpu.memory_space<vmem>>, vector<32x256xf32>,
    return
  }
  func.func @transform_0(%arg0: i32, %arg1: i32) -> (i32, i32) {
    %c0_i32 = arith.constant 0 : i32
    return %arg0, %arg1 : i32, i32
  }
  func.func @transform_1(%arg0: i32, %arg1: i32) -> (i32, i32) {
    %c0_i32 = arith.constant 0 : i32
    %c0_i32_0 = arith.constant 0 : i32
    return %arg0, %c0_i32 : i32, i32
  }
  func.func @transform_2(%arg0: i32, %arg1: i32) -> (i32, i32) {
    %c0_i32 = arith.constant 0 : i32
    %c0_i32_0 = arith.constant 0 : i32
    return %arg0, %c0_i32 : i32, i32
  }
  func.func @transform_3(%arg0: i32, %arg1: i32) -> (i32, i32) {
    %c0_i32 = arith.constant 0 : i32
    return %arg0, %arg1 : i32, i32
  }
}

</mosaic_0001>

<bundles_post_ra>
// kernel: tpu_custom_call.1
= control target key start
LH: loop header
LB: loop body
LE: loop exit
PB: predicated region body
PF: predicated region fallthrough
CT: control target
= control target key end

     0   :  { %8 = vsyncpa [#allocation3], 0  ;;  %s755_s0 = inlined_call_operand.vmem [shape: f32[64,256], index: 0, kind: input, shape index: {}]   ;;  %s756_s1 = inlined_call_operand.vmem [shape: f32[64,1], index: 1, kind: input, shape index: {}]   ;;  %s757_s2 = inlined_call_operand.vmem [shape: f32[64,1], index: 2, kind: input, shape index: {}]   ;;  %s758_s3 = inlined_call_operand.hbm [shape: f32[64,256], index: 3, kind: output, shape index: {}]  }
   0x1   :  { %10 = vsyncpa [#allocation3 + $0x1], 0  ;;  %s638_s12 = smov 0   ;;  %s640_s13 = smov 0  }
   0x2   :  { %s642_s14 = smov 0   ;;  %s644_s15 = smov 0  }
   0x3   :  { %s646_s16 = smov 0   ;;  %s648_s17 = smov 0  }
   0x4 LB: > { %s452_s18 = sadd.s32 4294967295, %s613_s17   ;;  %s453_s19 = sadd.s32 4294967294, %s613_s17   ;;  %s613_s17 = sphi %s648_s17, %s16_s17   ;;  %s609_s16 = sphi %s646_s16, %s765_s16   ;;  %s605_s15 = sphi %s644_s15, %s764_s15   ;;  %s601_s14 = sphi %s642_s14, %s763_s14   ;;  %s597_s13 = sphi %s640_s13, %s762_s13   ;;  %s593_s12 = sphi %s638_s12, %s761_s12  }
   0x5   : > { %s28_s20 = sadd.s32 1, %s609_s16  ;;  %s117_s21 = sadd.s32 1, %s601_s14 }
   0x6   : > { %p30_p0 = scmp.ge.s32.totalorder %s28_s20, 2  ;;  %p127_p1 = scmp.ne.s32.totalorder %s601_s14, %s597_s13 }
   0x7   : > { %p128_p2 = scmp.eq.s32.totalorder %s452_s18, 1  ;;  %p133_p3 = scmp.ne.s32.totalorder %s597_s13, %s593_s12 }
   0x8   : > { %s767_s20 = smov (%p30_p0, %s28_s20), 0  ;;  %p134_p5 = scmp.eq.s32.totalorder %s453_s19, 1 }
   0x9   : > { %p678_p4 = por %p128_p2, %p127_p1  ;;  %s112_s23 = ssub.s32 %s609_s16, %s767_s20 }
   0xa   : > { %p456_p6 = scmp.ge.s32.totalorder %s613_s17, 1  ;;  %p115_p7 = scmp.eq.s32.totalorder %s112_s23, 0 }
   0xb   : > { %p685_p8 = por %p134_p5, %p133_p3  ;;  %p185_p9 = scmp.lt.s32.totalorder %s613_s17, 3 }
   0xc   : > { %s691_s25 = scalar_select %p115_p7, %s601_s14, %s117_s21  }
   0xd   : > { %p186_p10 = pnand %p456_p6, %p185_p9 }
   0xe   : > { %s458_s26 = sshll.u32 (!%p186_p10), %s605_s15, 2  ;;  %s221_s11 = sand.u32 (!%p186_p10), 1, %s597_s13  }
   0xf   : > { %189 = sbr.rel (%p186_p10) target bundleno = 164 (0xa4), region = 32  ;;  %p226_p11 = scmp.lt.s32.totalorder (!%p186_p10), %s458_s26, 7 }
  0x10   : > { %s457_s18 = sshll.u32 (!%p186_p10), %s221_s11, 6  ;;  %s473_s21 = sshll.u32 (!%p186_p10), %s605_s15, 6 }
  0x11   : > { %s706_s19 = scalar_lea.vmem (!%p186_p10), [#allocation2], %s457_s18  ;;  %s331_s29 = scalar_lea.sflag (!%p186_p10), [#allocation3], %s221_s11 }
  0x12   : > { %s346_s15 = sshll.u32 (!%p186_p10), %s706_s19, 4  ;;  %s347_s15 = int_to_ptr.vmem [resolvable:$true] %s346_s15 }
  0x14   : > { %v615_v0 = vmov 0   ;;  %s769_s26 = smov (!%p226_p11, %s458_s26), 7 }
  0x15   : > { %533 = vset.pattern.permute.xlu1 %v615_v0  ;;  %532 = vset.pattern.permute.xlu0 %v615_v0  ;;  %s462_s27 = sshll.u32 %s769_s26, 3  ;;  %s471_s7 = sshll.u32 %s769_s26, 4 }
  0x16   : > { %534 = vset.pattern.permute.xlu2 %v615_v0  ;;  %s240_s30 = scalar_lea.vmem %s756_s1, %s462_s27  ;;  %s246_s6 = scalar_lea.vmem %s757_s2, %s462_s27 }
  0x17   : > { %v260_v1 = vld [vmem:[%s240_s30 + $0x10] sm:$0xff]  ;;  %v258_v2 = vld [vmem:[%s240_s30] sm:$0xff]  ;;  %v261_v4 = vld [vmem:[%s240_s30 + $0x18] sm:$0xff]  ;;  %s233_s10 = scalar_lea.vmem %s755_s0, %s471_s7  ;;  %s345_s27 = scalar_lea.hbm %s758_s3, %s473_s21 }
  0x18   : > { %274 = vperm.xlu1 %533, %v260_v1   ;;  %264 = vperm.xlu0 %532, %v258_v2   ;;  %v290_v3 = vld [vmem:[%s246_s6] sm:$0xff]  ;;  %v259_v5 = vld [vmem:[%s240_s30 + $0x8] sm:$0xff]  ;;  %v293_v7 = vld [vmem:[%s246_s6 + $0x18] sm:$0xff]  ;;  %s348_s28 = sshll.u32 %s345_s27, 4  ;;  %s555_s7 = scalar_lea.hbm %s758_s3, 128  ;;  %s349_s28 = int_to_ptr.hbm [resolvable:$true] %s348_s28 }
  0x19   : > { %296 = vperm.xlu2 %534, %v290_v3   ;;  %v291_v6 = vld [vmem:[%s246_s6 + $0x8] sm:$0xff]  ;;  %v292_v8 = vld [vmem:[%s246_s6 + $0x10] sm:$0xff]  ;;  %v250_v9 = vld [vmem:[%s233_s10] sm:$0xff]  ;;  %s549_s30 = sshra.s32 %s349_s28, 4  ;;  %s550_s30 = int_to_ptr.hbm [resolvable:$true] %s549_s30 }
  0x1a   : > { %v251_v10 = vld [vmem:[%s233_s10 + $0x8] sm:$0xff]  ;;  %v252_v18 = vld [vmem:[%s233_s10 + $0x10] sm:$0xff]  ;;  %v253_v19 = vld [vmem:[%s233_s10 + $0x18] sm:$0xff]  ;;  %s551_s4 = scalar_lea.hbm %s550_s30, 64  ;;  %p556_p1 = scmp.lt.s32.totalorder %s550_s30, %s758_s3 }
  0x1b   : > { %v254_v27 = vld [vmem:[%s233_s10 + $0x20] sm:$0xff]  ;;  %v256_v28 = vld [vmem:[%s233_s10 + $0x30] sm:$0xff]  ;;  %v257_v29 = vld [vmem:[%s233_s10 + $0x38] sm:$0xff]  ;;  %p552_p12 = scmp.ne.s32.totalorder %s550_s30, %s551_s4  ;;  %p557_p2 = scmp.lt.s32.totalorder %s555_s7, %s551_s4 }
  0x1c   : > { %v255_v30 = vld [vmem:[%s233_s10 + $0x28] sm:$0xff] }
  0x1d   : > { %p553_p13 = pnand %p552_p12, %p678_p4  ;;  %p558_p3 = por %p557_p2, %p556_p1 }
  0x1f   : > { %p554_p0 = pneg %p553_p13 }
  0x20   : > { %279 = vperm.xlu1 %533, %v261_v4   ;;  %269 = vperm.xlu0 %532, %v259_v5  }
  0x21   : > { %301 = vperm.xlu2 %534, %v291_v6   ;;  %p559_p5 = pnand %p558_p3, %p554_p0 }
  0x28   : > { %311 = vperm.xlu1 %533, %v293_v7   ;;  %306 = vperm.xlu0 %532, %v292_v8  }
  0x73   : > { %v297_v11 = vpop.permute.xlu2 %296 }
  0x7b   : > { %v302_v24 = vpop.permute.xlu2 %301 }
  0x8a   : > { %v275_v12 = vpop.permute.xlu1 %274  ;;  %v265_v13 = vpop.permute.xlu0 %264 }
  0x8b   : > { %v282_v14 = vmul.f32 %v265_v13, %v250_v9  ;;  %v283_v15 = vmul.f32 %v265_v13, %v251_v10  ;;  %v286_v31 = vmul.f32 %v275_v12, %v254_v27  ;;  %v287_v34 = vmul.f32 %v275_v12, %v255_v30 }
  0x8d   : > { %v314_v16 = vadd.f32 %v297_v11, %v282_v14  ;;  %v315_v17 = vadd.f32 %v297_v11, %v283_v15 }
  0x8f   : > { %322 = vst [vmem:[%s706_s19] sm:$0xff] %v314_v16 }
  0x90   : > { %323 = vst [vmem:[%s706_s19 + $0x8] sm:$0xff] %v315_v17 }
  0x92   : > { %v280_v20 = vpop.permute.xlu1 %279  ;;  %v270_v21 = vpop.permute.xlu0 %269 }
  0x93   : > { %v284_v22 = vmul.f32 %v270_v21, %v252_v18  ;;  %v285_v23 = vmul.f32 %v270_v21, %v253_v19  ;;  %v288_v32 = vmul.f32 %v280_v20, %v256_v28  ;;  %v289_v33 = vmul.f32 %v280_v20, %v257_v29 }
  0x95   : > { %v316_v25 = vadd.f32 %v302_v24, %v284_v22  ;;  %v317_v26 = vadd.f32 %v302_v24, %v285_v23 }
  0x97   : > { %324 = vst [vmem:[%s706_s19 + $0x10] sm:$0xff] %v316_v25 }
  0x98   : > { %325 = vst [vmem:[%s706_s19 + $0x18] sm:$0xff] %v317_v26 }
  0x9a   : > { %v312_v35 = vpop.permute.xlu1 %311  ;;  %v307_v36 = vpop.permute.xlu0 %306 }
  0x9b   : > { %v320_v37 = vadd.f32 %v312_v35, %v288_v32  ;;  %v321_v38 = vadd.f32 %v312_v35, %v289_v33  ;;  %v318_v39 = vadd.f32 %v307_v36, %v286_v31  ;;  %v319_v40 = vadd.f32 %v307_v36, %v287_v34 }
  0x9d   : > { %328 = vst [vmem:[%s706_s19 + $0x30] sm:$0xff] %v320_v37 }
  0x9e   : > { %329 = vst [vmem:[%s706_s19 + $0x38] sm:$0xff] %v321_v38 }
  0x9f   : > { %326 = vst [vmem:[%s706_s19 + $0x20] sm:$0xff] %v318_v39 }
  0xa0   : > { %327 = vst [vmem:[%s706_s19 + $0x28] sm:$0xff] %v319_v40 }
  0xa1   : > { %562 = shalt.err (!%p559_p5)
}
  0xa2   : > { %s616_s10 = smov 256   ;;  %s617_s11 = smov 16  }
  0xa3   : > { %474 = dma.vmem_to_hbm [thread:$0]  (%p678_p4), %s347_s15, 1024, %s349_s28, %s331_s29, %s616_s10, %s616_s10, %s617_s11  }
  0xa4 PF: > { %p480_p6 = scmp.ge.s32.totalorder %s613_s17, 2  ;;  %s363_s18 = sand.u32 1, %s593_s12  }
  0xa5   : > { %s364_s19 = scalar_lea.sflag [#allocation3], %s363_s18 }
  0xa6   : > { %p477_p7 = pnand %p480_p6, %p685_p8 }
  0xa8   : > { %p478_p9 = pneg %p477_p7 }
  0xaa   : > { %588 = dma.done.wait (%p478_p9), %s364_s19, 1024  }
  0xab   : > { %590 = vsyncadd (%p478_p9), %s364_s19, 4294966272  ;;  %s16_s17 = sadd.s32 1, %s613_s17   ;;  %s761_s12 = smov %s597_s13 }
  0xac   : > { %p13_p10 = scmp.ge.s32.totalorder %s16_s17, 4   ;;  %s762_s13 = smov %s601_s14 }
  0xad   : > { %s763_s14 = smov %s691_s25  ;;  %s764_s15 = smov %s609_s16 }
  0xae   : > { %s765_s16 = smov %s767_s20  ;;  %15 = sbr.rel (!%p13_p10) target bundleno = 4 (0x4), region = 73 }
  0xb3   :  { %370 = vsyncpa [#allocation3], 1 }
  0xb4   :  { %372 = vsyncpa [#allocation3 + $0x1], 1 }

</bundles_post_ra>
